<compile_context>
chip_gen: v7x
topology: tpu7x:2x2x1
jax: 0.10.0
libtpu: 0.0.40
codegen_flags: <defaults>
</compile_context>

<pallas_src>
import functools

import jax
import jax.numpy as jnp
from jax.experimental import pallas as pl
from jax.experimental.pallas import tpu as pltpu

HIDDEN = 128


def _round_up(n, m):
    return ((n + m - 1) // m) * m


def actor_kernel(alphas_ref,              # (2,) f32 in SMEM: PReLU alphas
                 x_ref,                   # (TB, S) f32 input tile
                 w1_ref, b1_ref,          # (S, H) bf16, (1, H) f32
                 w2_ref, b2_ref,          # (H, H) bf16, (1, H) f32
                 w3_ref, b3_ref,          # (H, A) bf16, (1, A) f32
                 o_ref):                  # (TB, A) f32 action probabilities
    a1 = alphas_ref[0]
    a2 = alphas_ref[1]

    # fc1 (bf16 MXU operands, f32 accumulation) + PReLU in f32.
    x = x_ref[...].astype(jnp.bfloat16)
    h1 = jnp.dot(x, w1_ref[...], preferred_element_type=jnp.float32) + b1_ref[...]
    h1 = jnp.where(h1 >= 0, h1, a1 * h1)

    # fc2 + PReLU.
    h2 = jnp.dot(h1.astype(jnp.bfloat16), w2_ref[...],
                 preferred_element_type=jnp.float32) + b2_ref[...]
    h2 = jnp.where(h2 >= 0, h2, a2 * h2)

    # fc3 + numerically stable softmax over the action axis (exact normalization).
    logits = jnp.dot(h2.astype(jnp.bfloat16), w3_ref[...],
                     preferred_element_type=jnp.float32) + b3_ref[...]
    m = jnp.max(logits, axis=-1, keepdims=True)
    e = jnp.exp(logits - m)
    probs = e / jnp.sum(e, axis=-1, keepdims=True)
    o_ref[...] = probs.astype(o_ref.dtype)


@functools.partial(jax.jit, static_argnames=("tb",))
def actor_forward(x, params, *, tb=1024):
    """x: [B, state_size] f32 -> [B, action_size] f32 action probabilities."""
    w1, b1, w2, b2, w3, b3, alphas = params
    B, S = x.shape
    H = w1.shape[1]
    A = w3.shape[1]

    # Batch tile: 8-row (f32 sublane) granule, capped by tb.
    tb_eff = min(tb, _round_up(B, 8))
    # v7x megacore guard: keep >= 2 grid steps when the batch is big enough to
    # split, so the "parallel" batch axis can be sharded over both TensorCores.
    if B > 16 and pl.cdiv(B, tb_eff) < 2:
        tb_eff = _round_up(pl.cdiv(B, 2), 8)

    grid = (pl.cdiv(B, tb_eff),)

    return pl.pallas_call(
        actor_kernel,
        out_shape=jax.ShapeDtypeStruct((B, A), jnp.float32),
        grid=grid,
        in_specs=[
            # merged PReLU alphas: whole (2,) f32 array resident in SMEM
            pl.BlockSpec(memory_space=pltpu.MemorySpace.SMEM),
            # batch-tiled f32 input (cast to bf16 inside the kernel)
            pl.BlockSpec((tb_eff, S), lambda i: (i, 0)),
            # weights / biases: constant index_map -> fetched once, VMEM-resident
            pl.BlockSpec((S, H), lambda i: (0, 0)),
            pl.BlockSpec((1, H), lambda i: (0, 0)),
            pl.BlockSpec((H, H), lambda i: (0, 0)),
            pl.BlockSpec((1, H), lambda i: (0, 0)),
            pl.BlockSpec((H, A), lambda i: (0, 0)),
            pl.BlockSpec((1, A), lambda i: (0, 0)),
        ],
        # Un-padded output: only the real action columns are written to HBM.
        out_specs=pl.BlockSpec((tb_eff, A), lambda i: (i, 0)),
        compiler_params=pltpu.CompilerParams(
            dimension_semantics=("parallel",)),   # v7x: shard batch tiles over 2 TCs
    )(alphas, x, w1, b1, w2, b2, w3, b3)


def init_params(key, state_size, action_size, hidden=HIDDEN):
    """Deterministic synthetic parameters. Weights stored [in, out], bf16 for MXU."""
    k1, k2, k3, k4, k5, k6 = jax.random.split(key, 6)
    s = 0.05
    w1 = (s * jax.random.normal(k1, (state_size, hidden))).astype(jnp.bfloat16)
    b1 = (s * jax.random.normal(k2, (1, hidden))).astype(jnp.float32)
    w2 = (s * jax.random.normal(k3, (hidden, hidden))).astype(jnp.bfloat16)
    b2 = (s * jax.random.normal(k4, (1, hidden))).astype(jnp.float32)
    w3 = (s * jax.random.normal(k5, (hidden, action_size))).astype(jnp.bfloat16)
    b3 = (s * jax.random.normal(k6, (1, action_size))).astype(jnp.float32)
    # nn.PReLU() default init: alpha = 0.25 (shared across channels); two layers.
    alphas = jnp.full((2,), 0.25, dtype=jnp.float32)
    return (w1, b1, w2, b2, w3, b3, alphas)


def actor_reference(x, params):
    """Pure-JAX reference with the same operand precisions (bf16 MXU, f32 math)."""
    w1, b1, w2, b2, w3, b3, alphas = params
    xb = x.astype(jnp.bfloat16)
    h1 = jnp.dot(xb, w1, preferred_element_type=jnp.float32) + b1
    h1 = jnp.where(h1 >= 0, h1, alphas[0] * h1)
    h2 = jnp.dot(h1.astype(jnp.bfloat16), w2, preferred_element_type=jnp.float32) + b2
    h2 = jnp.where(h2 >= 0, h2, alphas[1] * h2)
    logits = jnp.dot(h2.astype(jnp.bfloat16), w3, preferred_element_type=jnp.float32) + b3
    return jax.nn.softmax(logits, axis=-1)


if __name__ == "__main__":
    key = jax.random.PRNGKey(0)
    kx, kp, kx2 = jax.random.split(key, 3)

    state_size, action_size = 32, 8
    params = init_params(kp, state_size, action_size)

    # Small single-tile case.
    batch = 8
    x = jax.random.normal(kx, (batch, state_size), dtype=jnp.float32)
    out = jax.block_until_ready(actor_forward(x, params))
    ref = actor_reference(x, params)
    assert out.shape == (batch, action_size)
    # Exact softmax normalization -> rows sum to 1 up to float rounding.
    assert bool(jnp.allclose(jnp.sum(out, axis=-1), 1.0, atol=1e-3))
    assert bool(jnp.allclose(out, ref, atol=2e-3, rtol=2e-3))

    # Multi-tile grid case (batch tiling, partial last tile, parallel batch axis).
    batch2 = 300
    x2 = jax.random.normal(kx2, (batch2, state_size), dtype=jnp.float32)
    out2 = jax.block_until_ready(actor_forward(x2, params, tb=128))
    ref2 = actor_reference(x2, params)
    assert out2.shape == (batch2, action_size)
    assert bool(jnp.allclose(jnp.sum(out2, axis=-1), 1.0, atol=1e-3))
    assert bool(jnp.allclose(out2, ref2, atol=2e-3, rtol=2e-3))

    print("KERNEL_OK")
</pallas_src>

<mosaic_0001>
module attributes {stable_mosaic.version = 11 : i64} {
  func.func @actor_kernel(%arg0: i32, %arg1: memref<2xf32, #tpu.memory_space<smem>>, %arg2: memref<8x32xf32, #tpu.memory_space<vmem>>, %arg3: memref<32x128xbf16, #tpu.memory_space<vmem>>, %arg4: memref<1x128xf32, #tpu.memory_space<vmem>>, %arg5: memref<128x128xbf16, #tpu.memory_space<vmem>>, %arg6: memref<1x128xf32, #tpu.memory_space<vmem>>, %arg7: memref<128x8xbf16, #tpu.memory_space<vmem>>, %arg8: memref<1x8xf32, #tpu.memory_space<vmem>>, %arg9: memref<8x8xf32, #tpu.memory_space<vmem>>) attributes {dimension_semantics = [#tpu.dimension_semantics<parallel>], iteration_bounds = array<i64: 1>, scalar_prefetch = 0 : i64, scratch_operands = 0 : i64, tpu.core_type = #tpu.core_type<tc>, window_params = [{transform_indices = @transform_0, window_bounds = array<i64: 2>}, {transform_indices = @transform_1, window_bounds = array<i64: 8, 32>}, {pipeline_mode = #tpu.pipeline_mode<synchronous>, transform_indices = @transform_2, window_bounds = array<i64: 32, 128>}, {pipeline_mode = #tpu.pipeline_mode<synchronous>, transform_indices = @transform_3, window_bounds = array<i64: 1, 128>}, {pipeline_mode = #tpu.pipeline_mode<synchronous>, transform_indices = @transform_4, window_bounds = array<i64: 128, 128>}, {pipeline_mode = #tpu.pipeline_mode<synchronous>, transform_indices = @transform_5, window_bounds = array<i64: 1, 128>}, {pipeline_mode = #tpu.pipeline_mode<synchronous>, transform_indices = @transform_6, window_bounds = array<i64: 128, 8>}, {pipeline_mode = #tpu.pipeline_mode<synchronous>, transform_indices = @transform_7, window_bounds = array<i64: 1, 8>}, {transform_indices = @transform_8, window_bounds = array<i64: 8, 8>}]} {
    %c0 = arith.constant 0 : index
    %0 = memref.load %arg1[%c0] : memref<2xf32, #tpu.memory_space<smem>>
    %c1 = arith.constant 1 : index
    %1 = memref.load %arg1[%c1] : memref<2xf32, #tpu.memory_space<smem>>
    %c0_0 = arith.constant 0 : index
    %c0_1 = arith.constant 0 : index
    %2 = vector.load %arg2[%c0_0, %c0_1] : memref<8x32xf32, #tpu.memory_space<vmem>>, vector<8x32xf32>
    %3 = arith.truncf %2 : vector<8x32xf32> to vector<8x32xbf16>
    %c0_2 = arith.constant 0 : index
    %c0_3 = arith.constant 0 : index
    %4 = vector.load %arg3[%c0_2, %c0_3] : memref<32x128xbf16, #tpu.memory_space<vmem>>, vector<32x128xbf16>
    %cst = arith.constant dense<0.000000e+00> : vector<8x128xf32>
    %5 = tpu.matmul %3, %4, %cst {dimension_numbers = #tpu.dot_dimension_numbers<[1], [0], [0], [1], [0, 0, 1, 1], [], []>} : vector<8x32xbf16>, vector<32x128xbf16>, vector<8x128xf32> -> vector<8x128xf32>
    %c0_4 = arith.constant 0 : index
    %c0_5 = arith.constant 0 : index
    %6 = vector.load %arg4[%c0_4, %c0_5] : memref<1x128xf32, #tpu.memory_space<vmem>>, vector<1x128xf32>
    %7 = vector.broadcast %6 : vector<1x128xf32> to vector<8x128xf32>
    %8 = arith.addf %5, %7 : vector<8x128xf32>
    %cst_6 = arith.constant 0.000000e+00 : f32
    %9 = vector.broadcast %cst_6 : f32 to vector<8x128xf32>
    %10 = arith.cmpf oge, %8, %9 : vector<8x128xf32>
    %11 = vector.broadcast %0 : f32 to vector<8x128xf32>
    %12 = arith.mulf %11, %8 : vector<8x128xf32>
    %13 = arith.select %10, %8, %12 : vector<8x128xi1>, vector<8x128xf32>
    %14 = arith.truncf %13 : vector<8x128xf32> to vector<8x128xbf16>
    %c0_7 = arith.constant 0 : index
    %c0_8 = arith.constant 0 : index
    %15 = vector.load %arg5[%c0_7, %c0_8] : memref<128x128xbf16, #tpu.memory_space<vmem>>, vector<128x128xbf16>
    %cst_9 = arith.constant dense<0.000000e+00> : vector<8x128xf32>
    %16 = tpu.matmul %14, %15, %cst_9 {dimension_numbers = #tpu.dot_dimension_numbers<[1], [0], [0], [1], [0, 0, 1, 1], [], []>} : vector<8x128xbf16>, vector<128x128xbf16>, vector<8x128xf32> -> vector<8x128xf32>
    %c0_10 = arith.constant 0 : index
    %c0_11 = arith.constant 0 : index
    %17 = vector.load %arg6[%c0_10, %c0_11] : memref<1x128xf32, #tpu.memory_space<vmem>>, vector<1x128xf32>
    %18 = vector.broadcast %17 : vector<1x128xf32> to vector<8x128xf32>
    %19 = arith.addf %16, %18 : vector<8x128xf32>
    %cst_12 = arith.constant 0.000000e+00 : f32
    %20 = vector.broadcast %cst_12 : f32 to vector<8x128xf32>
    %21 = arith.cmpf oge, %19, %20 : vector<8x128xf32>
    %22 = vector.broadcast %1 : f32 to vector<8x128xf32>
    %23 = arith.mulf %22, %19 : vector<8x128xf32>
    %24 = arith.select %21, %19, %23 : vector<8x128xi1>, vector<8x128xf32>
    %25 = arith.truncf %24 : vector<8x128xf32> to vector<8x128xbf16>
    %c0_13 = arith.constant 0 : index
    %c0_14 = arith.constant 0 : index
    %26 = vector.load %arg7[%c0_13, %c0_14] : memref<128x8xbf16, #tpu.memory_space<vmem>>, vector<128x8xbf16>
    %cst_15 = arith.constant dense<0.000000e+00> : vector<8x8xf32>
    %27 = tpu.matmul %25, %26, %cst_15 {dimension_numbers = #tpu.dot_dimension_numbers<[1], [0], [0], [1], [0, 0, 1, 1], [], []>} : vector<8x128xbf16>, vector<128x8xbf16>, vector<8x8xf32> -> vector<8x8xf32>
    %c0_16 = arith.constant 0 : index
    %c0_17 = arith.constant 0 : index
    %28 = vector.load %arg8[%c0_16, %c0_17] : memref<1x8xf32, #tpu.memory_space<vmem>>, vector<1x8xf32>
    %29 = vector.broadcast %28 : vector<1x8xf32> to vector<8x8xf32>
    %30 = arith.addf %27, %29 : vector<8x8xf32>
    %cst_18 = arith.constant dense<0xFF800000> : vector<8xf32>
    %31 = vector.multi_reduction <maximumf>, %30, %cst_18 [1] : vector<8x8xf32> to vector<8xf32>
    %32 = vector.shape_cast %31 : vector<8xf32> to vector<8x1xf32>
    %33 = vector.broadcast %32 : vector<8x1xf32> to vector<8x8xf32>
    %34 = arith.subf %30, %33 : vector<8x8xf32>
    %35 = math.exp %34 : vector<8x8xf32>
    %cst_19 = arith.constant dense<0.000000e+00> : vector<8xf32>
    %36 = vector.multi_reduction <add>, %35, %cst_19 [1] : vector<8x8xf32> to vector<8xf32>
    %37 = vector.shape_cast %36 : vector<8xf32> to vector<8x1xf32>
    %38 = vector.broadcast %37 : vector<8x1xf32> to vector<8x8xf32>
    %39 = arith.divf %35, %38 : vector<8x8xf32>
    %c0_20 = arith.constant 0 : index
    %c0_21 = arith.constant 0 : index
    %40 = vector.load %arg9[%c0_20, %c0_21] : memref<8x8xf32, #tpu.memory_space<vmem>>, vector<8x8xf32>
    tpu.vector_store %arg9[%c0_20, %c0_21], %39 {strides = array<i32>} : memref<8x8xf32, #tpu.memory_space<vmem>>, vector<8x8xf32>,
    return
  }
  func.func @transform_0(%arg0: i32) -> i32 {
    %c0_i32 = arith.constant 0 : i32
    %c0_i32_0 = arith.constant 0 : i32
    return %c0_i32 : i32
  }
  func.func @transform_1(%arg0: i32) -> (i32, i32) {
    %c0_i32 = arith.constant 0 : i32
    %c0_i32_0 = arith.constant 0 : i32
    return %arg0, %c0_i32 : i32, i32
  }
  func.func @transform_2(%arg0: i32) -> (i32, i32) {
    %c0_i32 = arith.constant 0 : i32
    %c0_i32_0 = arith.constant 0 : i32
    %c0_i32_1 = arith.constant 0 : i32
    return %c0_i32, %c0_i32_0 : i32, i32
  }
  func.func @transform_3(%arg0: i32) -> (i32, i32) {
    %c0_i32 = arith.constant 0 : i32
    %c0_i32_0 = arith.constant 0 : i32
    %c0_i32_1 = arith.constant 0 : i32
    return %c0_i32, %c0_i32_0 : i32, i32
  }
  func.func @transform_4(%arg0: i32) -> (i32, i32) {
    %c0_i32 = arith.constant 0 : i32
    %c0_i32_0 = arith.constant 0 : i32
    %c0_i32_1 = arith.constant 0 : i32
    return %c0_i32, %c0_i32_0 : i32, i32
  }
  func.func @transform_5(%arg0: i32) -> (i32, i32) {
    %c0_i32 = arith.constant 0 : i32
    %c0_i32_0 = arith.constant 0 : i32
    %c0_i32_1 = arith.constant 0 : i32
    return %c0_i32, %c0_i32_0 : i32, i32
  }
  func.func @transform_6(%arg0: i32) -> (i32, i32) {
    %c0_i32 = arith.constant 0 : i32
    %c0_i32_0 = arith.constant 0 : i32
    %c0_i32_1 = arith.constant 0 : i32
    return %c0_i32, %c0_i32_0 : i32, i32
  }
  func.func @transform_7(%arg0: i32) -> (i32, i32) {
    %c0_i32 = arith.constant 0 : i32
    %c0_i32_0 = arith.constant 0 : i32
    %c0_i32_1 = arith.constant 0 : i32
    return %c0_i32, %c0_i32_0 : i32, i32
  }
  func.func @transform_8(%arg0: i32) -> (i32, i32) {
    %c0_i32 = arith.constant 0 : i32
    %c0_i32_0 = arith.constant 0 : i32
    return %arg0, %c0_i32 : i32, i32
  }
}

</mosaic_0001>

<bundles_post_ra>
// kernel: actor_forward.1
= control target key start
LH: loop header
LB: loop body
LE: loop exit
PB: predicated region body
PF: predicated region fallthrough
CT: control target
= control target key end

     0   :  { %13 = vsyncpa [#allocation5], 0  ;;  %s739_s0 = inlined_call_operand.vmem [shape: f32[2], index: 0, kind: input, shape index: {}]   ;;  %s740_s1 = inlined_call_operand.vmem [shape: f32[8,32], index: 1, kind: input, shape index: {}]   ;;  %s741_s2 = inlined_call_operand.hbm [shape: bf16[32,128], index: 2, kind: input, shape index: {}]   ;;  %s742_s3 = inlined_call_operand.vmem [shape: f32[1,128], index: 3, kind: input, shape index: {}]   ;;  %s743_s4 = inlined_call_operand.vmem [shape: bf16[128,128], index: 4, kind: input, shape index: {}]   ;;  %s744_s5 = inlined_call_operand.vmem [shape: f32[1,128], index: 5, kind: input, shape index: {}]   ;;  %s745_s6 = inlined_call_operand.vmem [shape: bf16[128,8], index: 6, kind: input, shape index: {}]   ;;  %s746_s7 = inlined_call_operand.vmem [shape: f32[1,8], index: 7, kind: input, shape index: {}]   ;;  %s747_s8 = inlined_call_operand.hbm [shape: f32[8,8], index: 8, kind: output, shape index: {}]  }
   0x1   :  { %14 = vsyncpa [#allocation3], 0 }
   0x2   :  { %15 = vsyncpa [#allocation4], 0  ;;  %s22_s29 = sshll.u32 %s739_s0, 4  ;;  %s23_s29 = int_to_ptr.vmem [resolvable:$true] %s22_s29 }
   0x3   :  { %s511_s30 = scalar_lea.vmem %s23_s29, 16  ;;  %p516_p1 = scmp.lt.s32.totalorder %s23_s29, %s23_s29 }
   0x4   :  { %p512_p0 = scmp.ne.s32.totalorder %s23_s29, %s511_s30  ;;  %p517_p2 = scmp.lt.s32.totalorder %s511_s30, %s511_s30 }
   0x6   :  { %p518_p3 = por %p517_p2, %p516_p1 }
   0x8   :  { %p519_p4 = pnand %p518_p3, %p512_p0 }
   0xa   :  { %522 = shalt.err (!%p519_p4)
}
   0xb   :  { %s573_s9 = smov [#allocation2]   ;;  %s574_s10 = smov [#allocation6]  }
   0xc   :  { %25 = dma.vmem_to_smem %s23_s29, 16, %s573_s9, [#allocation5]  }
   0xd   :  { %s33_s11 = sshll.u32 %s574_s10, 4  ;;  %s523_s14 = scalar_lea.hbm %s741_s2, 256  ;;  %s34_s11 = int_to_ptr.vmem [resolvable:$true] %s33_s11 }
   0xe   :  { %p524_p5 = scmp.ne.s32.totalorder %s741_s2, %s523_s14  ;;  %p527_p6 = scmp.lt.u32.totalorder %s523_s14, %s741_s2 }
  0x10   :  { %p529_p7 = pnand %p527_p6, %p524_p5 }
  0x12   :  { %532 = shalt.err (!%p529_p7)
}
  0x13   :  { %s533_s18 = scalar_lea.vmem %s34_s11, 256  ;;  %p538_p9 = scmp.lt.s32.totalorder %s34_s11, %s34_s11 }
  0x14   :  { %p534_p8 = scmp.ne.s32.totalorder %s34_s11, %s533_s18  ;;  %p539_p10 = scmp.lt.s32.totalorder %s533_s18, %s533_s18 }
  0x16   :  { %p540_p11 = por %p539_p10, %p538_p9 }
  0x18   :  { %p541_p12 = pnand %p540_p11, %p534_p8 }
  0x1a   :  { %544 = shalt.err (!%p541_p12)
}
  0x1b   :  { %s575_s19 = smov 64   ;;  %s576_s20 = smov 4  }
  0x1c   :  { %39 = dma.hbm_to_vmem [thread:$0]  %s741_s2, 256, %s34_s11, [#allocation3], %s575_s19, %s575_s19, %s576_s20  }
  0x1d   :  { %567 = dma.done.wait [#allocation5], 16  }
  0x1e   :  { %568 = vsyncadd [#allocation5], 4294967280 }
  0x1f   :  { %569 = dma.done.wait [#allocation3], 256  }
  0x20   :  { %570 = vsyncadd [#allocation3], 4294967040 }
  0x21   :  { %56 = sfence }
  0x22   :  { %v489_v0 = vld [vmem:[#allocation6] sm:$0xff]   ;;  %v577_v1 = vmov 0.0   ;;  %v490_v2 = vld [vmem:[#allocation6 + $0x8] sm:$0xff]   ;;  %vm578_vm0 = vmmov 0   ;;  %vm85_vm1 = vcmask 261120   ;;  %v493_v7 = vld [vmem:[%s743_s4 + $0x10] sm:$0xff]  }
  0x23   :  { %434 = vmatprep.subr.bf16.mxu0 %v577_v1  ;;  %442 = vmatprep.subr.bf16.mxu1 %v577_v1  ;;  %v60_v3 = vld [vmem:[%s740_s1] sm:$0xff]  ;;  %v492_v6 = vld [vmem:[%s743_s4 + $0x8] sm:$0xff]   ;;  %v494_v8 = vld [vmem:[%s743_s4 + $0x18] sm:$0xff]   ;;  %s58_s26 = sld [smem:[#allocation2]]  ;;  %s390_s9 = sld [smem:[#allocation2 + $0x1]]  ;;  %vm361_vm4 = vcmask 64512  }
  0x24   :  { %435 = vmatpush3.bf16.msra.mxu0 %v489_v0  ;;  %438 = vmatprep.mubr.msk.bf16.mxu0 %vm578_vm0, %v577_v1  ;;  %v491_v4 = vld [vmem:[%s743_s4] sm:$0xff]   ;;  %v61_v5 = vpack.c.bf16 %v60_v3, %v60_v3  ;;  %v496_v10 = vld [vmem:[%s743_s4 + $0x28] sm:$0xff]   ;;  %v497_v11 = vld [vmem:[%s743_s4 + $0x30] sm:$0xff]  }
  0x25   :  { %436 = vmatprep.subr.bf16.mxu0 %v577_v1  ;;  %458 = vmatprep.mubr.msk.bf16.mxu1 %vm578_vm0, %v577_v1  ;;  %v495_v9 = vld [vmem:[%s743_s4 + $0x20] sm:$0xff]   ;;  %v498_v12 = vld [vmem:[%s743_s4 + $0x38] sm:$0xff]   ;;  %v500_v14 = vld [vmem:[%s745_s6 + $0x8] sm:$0xff]  }
  0x26   :  { %443 = vmatpush3.bf16.msra.mxu1 %v491_v4  ;;  %v499_v13 = vld [vmem:[%s745_s6] sm:$0xff]   ;;  %v501_v15 = vld [vmem:[%s745_s6 + $0x10] sm:$0xff]   ;;  %v502_v16 = vld [vmem:[%s745_s6 + $0x18] sm:$0xff]  }
  0x27   :  { %444 = vmatprep.subr.bf16.mxu1 %v577_v1  ;;  %v503_v17 = vld [vmem:[%s745_s6 + $0x20] sm:$0xff]   ;;  %v504_v18 = vld [vmem:[%s745_s6 + $0x28] sm:$0xff]   ;;  %v505_v29 = vld [vmem:[%s745_s6 + $0x30] sm:$0xff]  }
  0x28   :  { %437 = vmatpush3.bf16.msra.mxu0 %v490_v2  ;;  %v391_v19 = vld [vmem:[%s742_s3] ss:$0 sm:$0xff]  ;;  %v506_v30 = vld [vmem:[%s745_s6 + $0x38] sm:$0xff]  }
  0x29   :  { %462 = vmatprep.subr.bf16.mxu0 %v577_v1  ;;  %v130_v21 = vstv %s58_s26  ;;  %v395_v31 = vld [vmem:[%s744_s5] ss:$0 sm:$0xff]  ;;  %v246_v33 = vstv %s390_s9  ;;  %s579_s5 = smov [#allocation7]  }
  0x2a   :  { %445 = vmatpush3.bf16.msra.mxu1 %v492_v6  ;;  %v404_v41 = vld [vmem:[%s746_s7] ss:$0 sm:$0xff]  ;;  %s380_s6 = sshll.u32 %s579_s5, 4  ;;  %s381_s6 = int_to_ptr.vmem [resolvable:$true] %s380_s6 }
  0x2b   :  { %439 = vmatmul.mubr.msk.bf16.vlgmr.msra.gmra.mrb[0].mxu0 %vm85_vm1, %v61_v5  ;;  %446 = vmatprep.subr.bf16.mxu1 %v577_v1  ;;  %s545_s7 = scalar_lea.vmem %s381_s6, 128  ;;  %p550_p0 = scmp.lt.s32.totalorder %s381_s6, %s381_s6 }
  0x2c   :  { %478 = vmatprep.mubr.msk.bf16.mxu0 %vm578_vm0, %v577_v1  ;;  %463 = vmatpush3.bf16.msra.mxu0 %v499_v13  ;;  %p546_p13 = scmp.ne.s32.totalorder %s381_s6, %s545_s7  ;;  %p551_p1 = scmp.lt.s32.totalorder %s545_s7, %s545_s7 }
  0x2d   :  { %464 = vmatprep.subr.bf16.mxu0 %v577_v1 }
  0x2e   :  { %447 = vmatpush3.bf16.msra.mxu1 %v493_v7  ;;  %p552_p2 = por %p551_p1, %p550_p0 }
  0x2f   :  { %448 = vmatprep.subr.bf16.mxu1 %v577_v1 }
  0x30   :  { %465 = vmatpush3.bf16.msra.mxu0 %v500_v14  ;;  %p553_p3 = pnand %p552_p2, %p546_p13 }
  0x31   :  { %466 = vmatprep.subr.bf16.mxu0 %v577_v1 }
  0x32   :  { %449 = vmatpush3.bf16.msra.mxu1 %v494_v8 }
  0x33   :  { %450 = vmatprep.subr.bf16.mxu1 %v577_v1 }
  0x34   :  { %467 = vmatpush3.bf16.msra.mxu0 %v501_v15 }
  0x35   :  { %468 = vmatprep.subr.bf16.mxu0 %v577_v1 }
  0x36   :  { %451 = vmatpush3.bf16.msra.mxu1 %v495_v9 }
  0x37   :  { %452 = vmatprep.subr.bf16.mxu1 %v577_v1 }
  0x38   :  { %469 = vmatpush3.bf16.msra.mxu0 %v502_v16 }
  0x39   :  { %470 = vmatprep.subr.bf16.mxu0 %v577_v1 }
  0x3a   :  { %453 = vmatpush3.bf16.msra.mxu1 %v496_v10 }
  0x3b   :  { %454 = vmatprep.subr.bf16.mxu1 %v577_v1 }
  0x3c   :  { %471 = vmatpush3.bf16.msra.mxu0 %v503_v17 }
  0x3d   :  { %472 = vmatprep.subr.bf16.mxu0 %v577_v1 }
  0x3e   :  { %455 = vmatpush3.bf16.msra.mxu1 %v497_v11 }
  0x3f   :  { %456 = vmatprep.subr.bf16.mxu1 %v577_v1 }
  0x40   :  { %473 = vmatpush3.bf16.msra.mxu0 %v504_v18 }
  0x41   :  { %474 = vmatprep.subr.bf16.mxu0 %v577_v1 }
  0x42   :  { %457 = vmatpush3.bf16.msra.mxu1 %v498_v12 }
  0x44   :  { %475 = vmatpush3.bf16.msra.mxu0 %v505_v29 }
  0x45   :  { %476 = vmatprep.subr.bf16.mxu0 %v577_v1 }
  0x48   :  { %477 = vmatpush3.bf16.msra.mxu0 %v506_v30 }
  0xfe   :  { %v123_v20 = vpop.f32.mrb[0].mxu0 }
  0xff   :  { %v124_v22 = vadd.f32 %v391_v19, %v123_v20  ;;  %v440_v23 = vpop.f32.mrb[1].mxu0 }
 0x100   :  { %v126_v24 = vpop.f32.mrb[2].mxu0 }
 0x101   :  { %vm129_vm2 = vcmp.ge.f32.partialorder %v124_v22, 0.0  ;;  %v131_v25 = vmul.f32 %v130_v21, %v124_v22  ;;  %v441_v26 = vpop.f32.mrb[3].mxu0 }
 0x103   :  { %v132_v27 = vsel %vm129_vm2, %v124_v22, %v131_v25 }
 0x104   :  { %v133_v28 = vpack.c.bf16 %v132_v27, %v132_v27 }
 0x106   :  { %459 = vmatmul.mubr.bf16.vlgmr.msra.gmra.mrb[0].mxu1 %v133_v28 }
 0x1d9   :  { %v239_v32 = vpop.f32.mrb[0].mxu1 }
 0x1da   :  { %v240_v34 = vadd.f32 %v395_v31, %v239_v32  ;;  %v460_v35 = vpop.f32.mrb[1].mxu1 }
 0x1db   :  { %v242_v36 = vpop.f32.mrb[2].mxu1 }
 0x1dc   :  { %vm245_vm3 = vcmp.ge.f32.partialorder %v240_v34, 0.0  ;;  %v247_v37 = vmul.f32 %v246_v33, %v240_v34  ;;  %v461_v38 = vpop.f32.mrb[3].mxu1 }
 0x1de   :  { %v248_v39 = vsel %vm245_vm3, %v240_v34, %v247_v37 }
 0x1df   :  { %v249_v40 = vpack.c.bf16 %v248_v39, %v248_v39 }
 0x1e1   :  { %479 = vmatmul.mubr.bf16.vlgmr.msra.gmra.mrb[4].mxu0 %v249_v40 }
 0x2b4   :  { %v355_v42 = vpop.f32.mrb[4].mxu0 }
 0x2b5   :  { %v356_v43 = vadd.f32 %v404_v41, %v355_v42  ;;  %v480_v44 = vpop.f32.mrb[5].mxu0 }
 0x2b6   :  { %v358_v45 = vpop.f32.mrb[6].mxu0 }
 0x2b7   :  { %v481_v46 = vpop.f32.mrb[7].mxu0  ;;  %v362_v47 = vsel %vm361_vm4, %v356_v43, -inf }
 0x2b8   :  { %363 = vmax.xlane.f32.xlu0 %v362_v47 }
 0x345   :  { %v364_v48 = vpop.xlane.xlu0 %363 }
 0x346   :  { %v365_v49 = vsub.f32 %v356_v43, %v364_v48 }
 0x348   :  { %v366_v50 = vmul.f32 1.442695, %v365_v49 }
 0x34a   :  { %507 = vpow2.f32 %v366_v50 }
 0x354   :  { %v508_v51 = vpop.eup %507 }
 0x355   :  { %v368_v52 = vsel %vm361_vm4, %v508_v51, 0.0 }
 0x356   :  { %369 = vadd.xlane.f32.xlu0 %v368_v52 }
 0x3e3   :  { %v370_v53 = vpop.xlane.xlu0 %369 }
 0x3e4   :  { %509 = vrcp.f32 %v370_v53 }
 0x3ee   :  { %v510_v54 = vpop.eup %509 }
 0x3ef   :  { %v372_v55 = vmul.f32 %v510_v54, %v508_v51 }
 0x3f1   :  { %373 = vst.msk [vmem:[#allocation7] sm:$0xff] %vm361_vm4, %v372_v55 }
 0x3f2   :  { %556 = shalt.err (!%p553_p3)
}
 0x3f3   :  { %s557_s16 = scalar_lea.hbm %s747_s8, 128 }
 0x3f4   :  { %p558_p4 = scmp.ne.s32.totalorder %s747_s8, %s557_s16  ;;  %p561_p5 = scmp.lt.u32.totalorder %s557_s16, %s747_s8 }
 0x3f6   :  { %p563_p6 = pnand %p561_p5, %p558_p4 }
 0x3f8   :  { %566 = shalt.err (!%p563_p6)
}
 0x3f9   :  { %383 = dma.vmem_to_hbm [thread:$0]  %s381_s6, 128, %s747_s8, [#allocation4]  }
 0x3fa   :  { %571 = dma.done.wait [#allocation4], 128  }
 0x3fb   :  { %572 = vsyncadd [#allocation4], 4294967168 }
 0x3fc   :  { %387 = vsyncpa [#allocation3], 1 }
 0x3fd   :  { %388 = vsyncpa [#allocation4], 1 }
 0x3fe   :  { %389 = vsyncpa [#allocation5], 1 }

</bundles_post_ra>
